<compile_context>
chip_gen: v7x
topology: tpu7x:2x2x1
jax: 0.10.0
libtpu: 0.0.40
codegen_flags: <defaults>
</compile_context>

<pallas_src>
import functools

import jax
import jax.numpy as jnp
from jax.experimental import pallas as pl
from jax.experimental.pallas import tpu as pltpu

BN_EPS = 1e-5
LANE = 128
H1, H2 = 512, 256  # hidden widths from the PyTorch module


# ---------------------------------------------------------------------------
# Kernels
# ---------------------------------------------------------------------------
def _ffn_fused_kernel(x_ref,
                      w1_ref, g1_ref, be1_ref,
                      w2_ref, g2_ref, be2_ref,
                      w3_ref, b3_ref,
                      o_ref):
    """Single-block fully-fused forward (whole batch resident in VMEM)."""
    # ---- Linear(input_dim, 512); bias folded away (cancelled by BN mean) ----
    x = x_ref[...].astype(jnp.bfloat16)
    h = jnp.dot(x, w1_ref[...], preferred_element_type=jnp.float32)

    # ---- BatchNorm1d(512): folded scale/shift, no centered temporary ----
    mu1 = jnp.mean(h, axis=0, keepdims=True)
    m21 = jnp.mean(h * h, axis=0, keepdims=True)
    s1 = g1_ref[...] * jax.lax.rsqrt(m21 - mu1 * mu1 + BN_EPS)   # [1,H1]
    t1 = be1_ref[...] - mu1 * s1                                 # [1,H1]
    a1 = jnp.maximum(h * s1 + t1, 0.0).astype(jnp.bfloat16)      # BN+ReLU fused

    # ---- Linear(512, 256); bias folded away ----
    h2 = jnp.dot(a1, w2_ref[...], preferred_element_type=jnp.float32)

    # ---- BatchNorm1d(256) ----
    mu2 = jnp.mean(h2, axis=0, keepdims=True)
    m22 = jnp.mean(h2 * h2, axis=0, keepdims=True)
    s2 = g2_ref[...] * jax.lax.rsqrt(m22 - mu2 * mu2 + BN_EPS)
    t2 = be2_ref[...] - mu2 * s2
    a2 = jnp.maximum(h2 * s2 + t2, 0.0).astype(jnp.bfloat16)

    # ---- Linear(256, output_dim_padded) ----
    out = jnp.dot(a2, w3_ref[...], preferred_element_type=jnp.float32)
    o_ref[...] = (out + b3_ref[...]).astype(o_ref.dtype)


def _pass1_kernel(x_ref, w1_ref, h1_ref, st1_ref):
    """Tiled pass 1: layer-1 matmul + per-feature sum / sum-of-squares."""
    i = pl.program_id(0)
    h = jnp.dot(x_ref[...].astype(jnp.bfloat16), w1_ref[...],
                preferred_element_type=jnp.float32)
    h1_ref[...] = h

    @pl.when(i == 0)
    def _():
        st1_ref[...] = jnp.zeros_like(st1_ref)

    st1_ref[0:1, :] += jnp.sum(h, axis=0, keepdims=True)
    st1_ref[1:2, :] += jnp.sum(h * h, axis=0, keepdims=True)


def _pass2_kernel(h1_ref, s1_ref, t1_ref, w2_ref, h2_ref, st2_ref):
    """Tiled pass 2: folded BN1 + ReLU + layer-2 matmul + layer-2 stats."""
    i = pl.program_id(0)
    a = jnp.maximum(h1_ref[...] * s1_ref[...] + t1_ref[...], 0.0)
    h = jnp.dot(a.astype(jnp.bfloat16), w2_ref[...],
                preferred_element_type=jnp.float32)
    h2_ref[...] = h

    @pl.when(i == 0)
    def _():
        st2_ref[...] = jnp.zeros_like(st2_ref)

    st2_ref[0:1, :] += jnp.sum(h, axis=0, keepdims=True)
    st2_ref[1:2, :] += jnp.sum(h * h, axis=0, keepdims=True)


def _pass3_kernel(h2_ref, s2_ref, t2_ref, w3_ref, b3_ref, o_ref):
    """Tiled pass 3: folded BN2 + ReLU + output matmul (+ bias)."""
    a = jnp.maximum(h2_ref[...] * s2_ref[...] + t2_ref[...], 0.0)
    out = jnp.dot(a.astype(jnp.bfloat16), w3_ref[...],
                  preferred_element_type=jnp.float32)
    o_ref[...] = (out + b3_ref[...]).astype(o_ref.dtype)


# ---------------------------------------------------------------------------
# Wrappers
# ---------------------------------------------------------------------------
def _vmem_limit_bytes():
    """Generation-aware scoped-VMEM limit (~96 MiB on v5e/v6e, 48 MiB on v7x)."""
    try:
        cap = int(pltpu.get_tpu_info().vmem_capacity_bytes)
    except Exception:  # pragma: no cover - conservative fallback
        cap = 64 * 1024 * 1024
    return min((cap * 3) // 4, 100 * 1024 * 1024)


def _fused_vmem_peak(batch, in_dim, out_pad):
    """Conservative single-block peak: f32 slabs + bf16 copies + one transient."""
    act = batch * in_dim * (4 + 2)          # x f32 + bf16 copy
    act += batch * H1 * (4 + 4 + 2)         # h f32, h*h transient, relu'd bf16
    act += batch * H2 * (4 + 4 + 2)
    act += batch * out_pad * (4 + 4)        # matmul acc + output block
    w = 2 * (in_dim * H1 + H1 * H2 + H2 * out_pad)
    w += 4 * (2 * H1 + 2 * H2 + out_pad)    # BN rows + b3
    return act + w


def _pick_batch_tile(batch):
    for t in (2048, 1024, 512, 256, 128, 64, 32, 16, 8):
        if batch % t == 0:
            return t
    raise ValueError("Batch must be a multiple of 8 for the batch-tiled path.")


def _bn_scale_shift(stats, g, beta, n):
    """Fold training-mode BN into per-feature (scale, shift) from raw sums."""
    mu = stats[0:1, :] / n
    var = stats[1:2, :] / n - mu * mu
    s = g * jax.lax.rsqrt(var + BN_EPS)
    t = beta - mu * s
    return s, t


def _feedforward_fused(x, p, out_pad, vmem_limit):
    batch, in_dim = x.shape
    vmem = pl.BlockSpec(memory_space=pltpu.MemorySpace.VMEM)
    args = (x, p["w1"], p["g1"], p["beta1"],
            p["w2"], p["g2"], p["beta2"], p["w3"], p["b3"])
    flops = 2 * batch * (in_dim * H1 + H1 * H2 + H2 * out_pad)
    bytes_accessed = (x.size * 4
                      + (p["w1"].size + p["w2"].size + p["w3"].size) * 2
                      + (p["g1"].size + p["beta1"].size + p["g2"].size
                         + p["beta2"].size + p["b3"].size) * 4
                      + batch * out_pad * 4)
    return pl.pallas_call(
        _ffn_fused_kernel,
        out_shape=jax.ShapeDtypeStruct((batch, out_pad), jnp.float32),
        in_specs=[vmem] * len(args),
        out_specs=vmem,
        cost_estimate=pl.CostEstimate(flops=int(flops),
                                      transcendentals=H1 + H2,
                                      bytes_accessed=int(bytes_accessed)),
        compiler_params=pltpu.CompilerParams(vmem_limit_bytes=int(vmem_limit)),
    )(*args)


def _feedforward_tiled(x, p, out_pad, tile_b, vmem_limit):
    """Batch-tiled two-pass BN: 3 pipelined sweeps over batch tiles."""
    batch, in_dim = x.shape
    nt = batch // tile_b
    cp_arb = pltpu.CompilerParams(dimension_semantics=("arbitrary",),
                                  vmem_limit_bytes=int(vmem_limit))
    cp_par = pltpu.CompilerParams(dimension_semantics=("parallel",),
                                  vmem_limit_bytes=int(vmem_limit))

    # Pass 1: h1 = x @ w1  (+ per-feature sum / sum-of-squares accumulation).
    h1, st1 = pl.pallas_call(
        _pass1_kernel,
        grid=(nt,),
        in_specs=[pl.BlockSpec((tile_b, in_dim), lambda i: (i, 0)),
                  pl.BlockSpec((in_dim, H1), lambda i: (0, 0))],
        out_specs=(pl.BlockSpec((tile_b, H1), lambda i: (i, 0)),
                   pl.BlockSpec((2, H1), lambda i: (0, 0))),
        out_shape=(jax.ShapeDtypeStruct((batch, H1), jnp.float32),
                   jax.ShapeDtypeStruct((2, H1), jnp.float32)),
        compiler_params=cp_arb,
    )(x, p["w1"])
    s1, t1 = _bn_scale_shift(st1, p["g1"], p["beta1"], batch)

    # Pass 2: BN1+ReLU, h2 = a1 @ w2  (+ layer-2 stats).
    h2, st2 = pl.pallas_call(
        _pass2_kernel,
        grid=(nt,),
        in_specs=[pl.BlockSpec((tile_b, H1), lambda i: (i, 0)),
                  pl.BlockSpec((1, H1), lambda i: (0, 0)),
                  pl.BlockSpec((1, H1), lambda i: (0, 0)),
                  pl.BlockSpec((H1, H2), lambda i: (0, 0))],
        out_specs=(pl.BlockSpec((tile_b, H2), lambda i: (i, 0)),
                   pl.BlockSpec((2, H2), lambda i: (0, 0))),
        out_shape=(jax.ShapeDtypeStruct((batch, H2), jnp.float32),
                   jax.ShapeDtypeStruct((2, H2), jnp.float32)),
        compiler_params=cp_arb,
    )(h1, s1, t1, p["w2"])
    s2, t2 = _bn_scale_shift(st2, p["g2"], p["beta2"], batch)

    # Pass 3: BN2+ReLU, out = a2 @ w3 + b3 (batch tiles independent -> parallel).
    out = pl.pallas_call(
        _pass3_kernel,
        grid=(nt,),
        in_specs=[pl.BlockSpec((tile_b, H2), lambda i: (i, 0)),
                  pl.BlockSpec((1, H2), lambda i: (0, 0)),
                  pl.BlockSpec((1, H2), lambda i: (0, 0)),
                  pl.BlockSpec((H2, out_pad), lambda i: (0, 0)),
                  pl.BlockSpec((1, out_pad), lambda i: (0, 0))],
        out_specs=pl.BlockSpec((tile_b, out_pad), lambda i: (i, 0)),
        out_shape=jax.ShapeDtypeStruct((batch, out_pad), jnp.float32),
        compiler_params=cp_par,
    )(h2, s2, t2, p["w3"], p["b3"])
    return out


@functools.partial(jax.jit, static_argnames=("out_dim", "force_tiled", "tile_b",
                                             "return_padded"))
def feedforward_net(x, prepared, *, out_dim, force_tiled=False, tile_b=None,
                    return_padded=False):
    """x: [B, input_dim] f32.  prepared: output of prepare_params()."""
    batch, in_dim = x.shape
    out_pad = prepared["w3"].shape[1]
    vmem_limit = _vmem_limit_bytes()

    fused_fits = _fused_vmem_peak(batch, in_dim, out_pad) < vmem_limit
    if force_tiled or not fused_fits:
        tb = tile_b if tile_b is not None else _pick_batch_tile(batch)
        assert batch % tb == 0 and tb % 8 == 0, (
            "Batch-tiled path needs batch divisible by an 8-multiple tile.")
        out = _feedforward_tiled(x, prepared, out_pad, tb, vmem_limit)
    else:
        out = _feedforward_fused(x, prepared, out_pad, vmem_limit)

    if return_padded:
        return out          # lane-padded (B, out_pad) slab; no extra slice pass
    return out[:, :out_dim]


# ---------------------------------------------------------------------------
# Parameters
# ---------------------------------------------------------------------------
def init_params(key, input_dim, output_dim):
    """Deterministic synthetic parameters. Linear weights stored as [in, out]
    (transpose of PyTorch's [out, in]); BN gamma/beta are [1, C]."""
    ks = jax.random.split(key, 7)

    def lin(k, fan_in, fan_out):
        bound = 1.0 / jnp.sqrt(fan_in)
        kw, kb = jax.random.split(k)
        w = jax.random.uniform(kw, (fan_in, fan_out), jnp.float32, -bound, bound)
        b = jax.random.uniform(kb, (1, fan_out), jnp.float32, -bound, bound)
        return w, b

    w1, b1 = lin(ks[0], input_dim, H1)
    w2, b2 = lin(ks[1], H1, H2)
    w3, b3 = lin(ks[2], H2, output_dim)
    g1 = 1.0 + 0.01 * jax.random.normal(ks[3], (1, H1), jnp.float32)
    beta1 = 0.01 * jax.random.normal(ks[4], (1, H1), jnp.float32)
    g2 = 1.0 + 0.01 * jax.random.normal(ks[5], (1, H2), jnp.float32)
    beta2 = 0.01 * jax.random.normal(ks[6], (1, H2), jnp.float32)
    return dict(w1=w1, b1=b1, g1=g1, beta1=beta1,
                w2=w2, b2=b2, g2=g2, beta2=beta2,
                w3=w3, b3=b3)


def prepare_params(params):
    """One-time kernel-side parameter prep (hoisted out of the hot path):
    bf16 MXU weights, lane-padded w3/b3 (b1/b2 dropped: cancelled by BN mean)."""
    out_dim = int(params["w3"].shape[1])
    out_pad = ((out_dim + LANE - 1) // LANE) * LANE
    w3 = jnp.pad(params["w3"], ((0, 0), (0, out_pad - out_dim)))
    b3 = jnp.pad(params["b3"], ((0, 0), (0, out_pad - out_dim)))
    prepared = dict(
        w1=params["w1"].astype(jnp.bfloat16),
        w2=params["w2"].astype(jnp.bfloat16),
        w3=w3.astype(jnp.bfloat16),
        b3=b3.astype(jnp.float32),
        g1=params["g1"].astype(jnp.float32),
        beta1=params["beta1"].astype(jnp.float32),
        g2=params["g2"].astype(jnp.float32),
        beta2=params["beta2"].astype(jnp.float32),
    )
    return prepared, out_dim


# ---------------------------------------------------------------------------
# References
# ---------------------------------------------------------------------------
def _bn_ref(h, g, beta):
    mu = h.mean(0, keepdims=True)
    hc = h - mu
    var = (hc * hc).mean(0, keepdims=True)
    return hc * jax.lax.rsqrt(var + BN_EPS) * g + beta


def feedforward_net_ref_f32(x, p):
    """Exact f32 reference of the original PyTorch module (training-mode BN)."""
    h = x @ p["w1"] + p["b1"]
    h = jnp.maximum(_bn_ref(h, p["g1"], p["beta1"]), 0.0)
    h = h @ p["w2"] + p["b2"]
    h = jnp.maximum(_bn_ref(h, p["g2"], p["beta2"]), 0.0)
    return h @ p["w3"] + p["b3"]


def feedforward_net_ref_bf16(x, p):
    """Reference with the kernel's precision policy and BN folding."""
    bf = jnp.bfloat16

    def bn_relu(h, g, beta):
        mu = jnp.mean(h, 0, keepdims=True)
        m2 = jnp.mean(h * h, 0, keepdims=True)
        s = g * jax.lax.rsqrt(m2 - mu * mu + BN_EPS)
        t = beta - mu * s
        return jnp.maximum(h * s + t, 0.0)

    h = jnp.dot(x.astype(bf), p["w1"].astype(bf), preferred_element_type=jnp.float32)
    h = bn_relu(h, p["g1"], p["beta1"])
    h = jnp.dot(h.astype(bf), p["w2"].astype(bf), preferred_element_type=jnp.float32)
    h = bn_relu(h, p["g2"], p["beta2"])
    return jnp.dot(h.astype(bf), p["w3"].astype(bf),
                   preferred_element_type=jnp.float32) + p["b3"]


# ---------------------------------------------------------------------------
if __name__ == "__main__":
    INPUT_DIM = 32
    OUTPUT_DIM = 16

    key = jax.random.PRNGKey(0)
    kx, kp, kx2 = jax.random.split(key, 3)
    params = init_params(kp, INPUT_DIM, OUTPUT_DIM)
    prepared, out_dim = prepare_params(params)

    # --- Small batch: single-block fused path -------------------------------
    x = jax.random.normal(kx, (8, INPUT_DIM), jnp.float32)
    out = jax.block_until_ready(feedforward_net(x, prepared, out_dim=out_dim))
    assert out.shape == (8, OUTPUT_DIM)

    ref_bf = feedforward_net_ref_bf16(x, params)
    assert jnp.allclose(out, ref_bf, atol=5e-3, rtol=5e-3), \
        float(jnp.max(jnp.abs(out - ref_bf)))
    ref_f32 = feedforward_net_ref_f32(x, params)
    assert float(jnp.max(jnp.abs(out - ref_f32))) < 0.25

    # --- Batch-tiled two-pass-BN path (forced, small tiles) -----------------
    x2 = jax.random.normal(kx2, (64, INPUT_DIM), jnp.float32)
    out2 = jax.block_until_ready(
        feedforward_net(x2, prepared, out_dim=out_dim, force_tiled=True, tile_b=16))
    assert out2.shape == (64, OUTPUT_DIM)

    ref_bf2 = feedforward_net_ref_bf16(x2, params)
    assert jnp.allclose(out2, ref_bf2, atol=5e-3, rtol=5e-3), \
        float(jnp.max(jnp.abs(out2 - ref_bf2)))
    assert float(jnp.max(jnp.abs(out2 - feedforward_net_ref_f32(x2, params)))) < 0.25

    print("KERNEL_OK")
</pallas_src>

<mosaic_0001>
module attributes {stable_mosaic.version = 11 : i64} {
  func.func @_ffn_fused_kernel(%arg0: memref<8x32xf32, #tpu.memory_space<vmem>>, %arg1: memref<32x512xbf16, #tpu.memory_space<vmem>>, %arg2: memref<1x512xf32, #tpu.memory_space<vmem>>, %arg3: memref<1x512xf32, #tpu.memory_space<vmem>>, %arg4: memref<512x256xbf16, #tpu.memory_space<vmem>>, %arg5: memref<1x256xf32, #tpu.memory_space<vmem>>, %arg6: memref<1x256xf32, #tpu.memory_space<vmem>>, %arg7: memref<256x128xbf16, #tpu.memory_space<vmem>>, %arg8: memref<1x128xf32, #tpu.memory_space<vmem>>, %arg9: memref<8x128xf32, #tpu.memory_space<vmem>>) attributes {dimension_semantics = [], scalar_prefetch = 0 : i64, scratch_operands = 0 : i64, tpu.core_type = #tpu.core_type<tc>} {
    %c0 = arith.constant 0 : index
    %c0_0 = arith.constant 0 : index
    %0 = vector.load %arg0[%c0, %c0_0] : memref<8x32xf32, #tpu.memory_space<vmem>>, vector<8x32xf32>
    %1 = arith.truncf %0 : vector<8x32xf32> to vector<8x32xbf16>
    %c0_1 = arith.constant 0 : index
    %c0_2 = arith.constant 0 : index
    %2 = vector.load %arg1[%c0_1, %c0_2] : memref<32x512xbf16, #tpu.memory_space<vmem>>, vector<32x512xbf16>
    %cst = arith.constant dense<0.000000e+00> : vector<8x512xf32>
    %3 = tpu.matmul %1, %2, %cst {dimension_numbers = #tpu.dot_dimension_numbers<[1], [0], [0], [1], [0, 0, 1, 1], [], []>} : vector<8x32xbf16>, vector<32x512xbf16>, vector<8x512xf32> -> vector<8x512xf32>
    %cst_3 = arith.constant dense<0.000000e+00> : vector<512xf32>
    %4 = vector.multi_reduction <add>, %3, %cst_3 [0] : vector<8x512xf32> to vector<512xf32>
    %5 = vector.shape_cast %4 : vector<512xf32> to vector<1x512xf32>
    %cst_4 = arith.constant 8.000000e+00 : f32
    %6 = vector.broadcast %cst_4 : f32 to vector<1x512xf32>
    %7 = arith.divf %5, %6 : vector<1x512xf32>
    %8 = arith.mulf %3, %3 : vector<8x512xf32>
    %cst_5 = arith.constant dense<0.000000e+00> : vector<512xf32>
    %9 = vector.multi_reduction <add>, %8, %cst_5 [0] : vector<8x512xf32> to vector<512xf32>
    %10 = vector.shape_cast %9 : vector<512xf32> to vector<1x512xf32>
    %cst_6 = arith.constant 8.000000e+00 : f32
    %11 = vector.broadcast %cst_6 : f32 to vector<1x512xf32>
    %12 = arith.divf %10, %11 : vector<1x512xf32>
    %c0_7 = arith.constant 0 : index
    %c0_8 = arith.constant 0 : index
    %13 = vector.load %arg2[%c0_7, %c0_8] : memref<1x512xf32, #tpu.memory_space<vmem>>, vector<1x512xf32>
    %14 = arith.mulf %7, %7 : vector<1x512xf32>
    %15 = arith.subf %12, %14 : vector<1x512xf32>
    %cst_9 = arith.constant 9.99999974E-6 : f32
    %16 = vector.broadcast %cst_9 : f32 to vector<1x512xf32>
    %17 = arith.addf %15, %16 : vector<1x512xf32>
    %18 = math.rsqrt %17 : vector<1x512xf32>
    %19 = arith.mulf %13, %18 : vector<1x512xf32>
    %c0_10 = arith.constant 0 : index
    %c0_11 = arith.constant 0 : index
    %20 = vector.load %arg3[%c0_10, %c0_11] : memref<1x512xf32, #tpu.memory_space<vmem>>, vector<1x512xf32>
    %21 = arith.mulf %7, %19 : vector<1x512xf32>
    %22 = arith.subf %20, %21 : vector<1x512xf32>
    %23 = vector.broadcast %19 : vector<1x512xf32> to vector<8x512xf32>
    %24 = arith.mulf %3, %23 : vector<8x512xf32>
    %25 = vector.broadcast %22 : vector<1x512xf32> to vector<8x512xf32>
    %26 = arith.addf %24, %25 : vector<8x512xf32>
    %cst_12 = arith.constant 0.000000e+00 : f32
    %27 = vector.broadcast %cst_12 : f32 to vector<8x512xf32>
    %28 = arith.maximumf %26, %27 : vector<8x512xf32>
    %29 = arith.truncf %28 : vector<8x512xf32> to vector<8x512xbf16>
    %c0_13 = arith.constant 0 : index
    %c0_14 = arith.constant 0 : index
    %30 = vector.load %arg4[%c0_13, %c0_14] : memref<512x256xbf16, #tpu.memory_space<vmem>>, vector<512x256xbf16>
    %cst_15 = arith.constant dense<0.000000e+00> : vector<8x256xf32>
    %31 = tpu.matmul %29, %30, %cst_15 {dimension_numbers = #tpu.dot_dimension_numbers<[1], [0], [0], [1], [0, 0, 1, 1], [], []>} : vector<8x512xbf16>, vector<512x256xbf16>, vector<8x256xf32> -> vector<8x256xf32>
    %cst_16 = arith.constant dense<0.000000e+00> : vector<256xf32>
    %32 = vector.multi_reduction <add>, %31, %cst_16 [0] : vector<8x256xf32> to vector<256xf32>
    %33 = vector.shape_cast %32 : vector<256xf32> to vector<1x256xf32>
    %cst_17 = arith.constant 8.000000e+00 : f32
    %34 = vector.broadcast %cst_17 : f32 to vector<1x256xf32>
    %35 = arith.divf %33, %34 : vector<1x256xf32>
    %36 = arith.mulf %31, %31 : vector<8x256xf32>
    %cst_18 = arith.constant dense<0.000000e+00> : vector<256xf32>
    %37 = vector.multi_reduction <add>, %36, %cst_18 [0] : vector<8x256xf32> to vector<256xf32>
    %38 = vector.shape_cast %37 : vector<256xf32> to vector<1x256xf32>
    %cst_19 = arith.constant 8.000000e+00 : f32
    %39 = vector.broadcast %cst_19 : f32 to vector<1x256xf32>
    %40 = arith.divf %38, %39 : vector<1x256xf32>
    %c0_20 = arith.constant 0 : index
    %c0_21 = arith.constant 0 : index
    %41 = vector.load %arg5[%c0_20, %c0_21] : memref<1x256xf32, #tpu.memory_space<vmem>>, vector<1x256xf32>
    %42 = arith.mulf %35, %35 : vector<1x256xf32>
    %43 = arith.subf %40, %42 : vector<1x256xf32>
    %cst_22 = arith.constant 9.99999974E-6 : f32
    %44 = vector.broadcast %cst_22 : f32 to vector<1x256xf32>
    %45 = arith.addf %43, %44 : vector<1x256xf32>
    %46 = math.rsqrt %45 : vector<1x256xf32>
    %47 = arith.mulf %41, %46 : vector<1x256xf32>
    %c0_23 = arith.constant 0 : index
    %c0_24 = arith.constant 0 : index
    %48 = vector.load %arg6[%c0_23, %c0_24] : memref<1x256xf32, #tpu.memory_space<vmem>>, vector<1x256xf32>
    %49 = arith.mulf %35, %47 : vector<1x256xf32>
    %50 = arith.subf %48, %49 : vector<1x256xf32>
    %51 = vector.broadcast %47 : vector<1x256xf32> to vector<8x256xf32>
    %52 = arith.mulf %31, %51 : vector<8x256xf32>
    %53 = vector.broadcast %50 : vector<1x256xf32> to vector<8x256xf32>
    %54 = arith.addf %52, %53 : vector<8x256xf32>
    %cst_25 = arith.constant 0.000000e+00 : f32
    %55 = vector.broadcast %cst_25 : f32 to vector<8x256xf32>
    %56 = arith.maximumf %54, %55 : vector<8x256xf32>
    %57 = arith.truncf %56 : vector<8x256xf32> to vector<8x256xbf16>
    %c0_26 = arith.constant 0 : index
    %c0_27 = arith.constant 0 : index
    %58 = vector.load %arg7[%c0_26, %c0_27] : memref<256x128xbf16, #tpu.memory_space<vmem>>, vector<256x128xbf16>
    %cst_28 = arith.constant dense<0.000000e+00> : vector<8x128xf32>
    %59 = tpu.matmul %57, %58, %cst_28 {dimension_numbers = #tpu.dot_dimension_numbers<[1], [0], [0], [1], [0, 0, 1, 1], [], []>} : vector<8x256xbf16>, vector<256x128xbf16>, vector<8x128xf32> -> vector<8x128xf32>
    %c0_29 = arith.constant 0 : index
    %c0_30 = arith.constant 0 : index
    %60 = vector.load %arg8[%c0_29, %c0_30] : memref<1x128xf32, #tpu.memory_space<vmem>>, vector<1x128xf32>
    %61 = vector.broadcast %60 : vector<1x128xf32> to vector<8x128xf32>
    %62 = arith.addf %59, %61 : vector<8x128xf32>
    %c0_31 = arith.constant 0 : index
    %c0_32 = arith.constant 0 : index
    %63 = vector.load %arg9[%c0_31, %c0_32] : memref<8x128xf32, #tpu.memory_space<vmem>>, vector<8x128xf32>
    tpu.vector_store %arg9[%c0_31, %c0_32], %62 {strides = array<i32>} : memref<8x128xf32, #tpu.memory_space<vmem>>, vector<8x128xf32>,
    return
  }
}

</mosaic_0001>

<bundles_post_ra>
// kernel: feedforward_net.1
= control target key start
LH: loop header
LB: loop body
LE: loop exit
PB: predicated region body
PF: predicated region fallthrough
CT: control target
= control target key end

     0   :  { %14 = vsyncpa [#allocation3], 0  ;;  %s1819_s0 = inlined_call_operand.hbm [shape: f32[8,32], index: 0, kind: input, shape index: {}]   ;;  %s1820_s1 = inlined_call_operand.hbm [shape: bf16[32,512], index: 1, kind: input, shape index: {}]   ;;  %s1821_s2 = inlined_call_operand.vmem [shape: f32[1,512], index: 2, kind: input, shape index: {}]   ;;  %s1822_s3 = inlined_call_operand.hbm [shape: f32[1,512], index: 3, kind: input, shape index: {}]   ;;  %s1823_s4 = inlined_call_operand.hbm [shape: bf16[512,256], index: 4, kind: input, shape index: {}]   ;;  %s1824_s5 = inlined_call_operand.vmem [shape: f32[1,256], index: 5, kind: input, shape index: {}]   ;;  %s1825_s6 = inlined_call_operand.vmem [shape: f32[1,256], index: 6, kind: input, shape index: {}]   ;;  %s1826_s7 = inlined_call_operand.hbm [shape: bf16[256,128], index: 7, kind: input, shape index: {}]   ;;  %s1827_s8 = inlined_call_operand.vmem [shape: f32[1,128], index: 8, kind: input, shape index: {}]   ;;  %s1828_s9 = inlined_call_operand.hbm [shape: f32[8,128], index: 9, kind: output, shape index: {}]  }
   0x1   :  { %15 = vsyncpa [#allocation6], 0 }
   0x2   :  { %16 = vsyncpa [#allocation9], 0 }
   0x3   :  { %17 = vsyncpa [#allocation4], 0  ;;  %s1609_s30 = smov [#allocation5]   ;;  %s1469_s13 = scalar_lea.hbm %s1820_s1, 1024 }
   0x4   :  { %s33_s10 = sshll.u32 %s1609_s30, 4  ;;  %p1470_p0 = scmp.ne.s32.totalorder %s1820_s1, %s1469_s13  ;;  %s34_s10 = int_to_ptr.vmem [resolvable:$true] %s33_s10 }
   0x5   :  { %p1473_p1 = scmp.lt.u32.totalorder %s1469_s13, %s1820_s1 }
   0x7   :  { %p1475_p2 = pnand %p1473_p1, %p1470_p0 }
   0x9   :  { %1478 = shalt.err (!%p1475_p2)
}
   0xa   :  { %s1479_s18 = scalar_lea.vmem %s34_s10, 1024  ;;  %p1484_p4 = scmp.lt.s32.totalorder %s34_s10, %s34_s10 }
   0xb   :  { %p1480_p3 = scmp.ne.s32.totalorder %s34_s10, %s1479_s18  ;;  %p1485_p5 = scmp.lt.s32.totalorder %s1479_s18, %s1479_s18 }
   0xd   :  { %p1486_p6 = por %p1485_p5, %p1484_p4 }
   0xf   :  { %p1487_p7 = pnand %p1486_p6, %p1480_p3 }
  0x11   :  { %1490 = shalt.err (!%p1487_p7)
}
  0x12   :  { %s1610_s19 = smov 256   ;;  %s1611_s20 = smov 16  }
  0x13   :  { %39 = dma.hbm_to_vmem [thread:$0]  %s1820_s1, 1024, %s34_s10, [#allocation6], %s1610_s19, %s1610_s19, %s1611_s20  }
  0x14   :  { %s1612_s23 = smov [#allocation8]   ;;  %s1491_s27 = scalar_lea.hbm %s1823_s4, 8192 }
  0x15   :  { %s57_s24 = sshll.u32 %s1612_s23, 4  ;;  %p1492_p8 = scmp.ne.s32.totalorder %s1823_s4, %s1491_s27  ;;  %s58_s24 = int_to_ptr.vmem [resolvable:$true] %s57_s24 }
  0x16   :  { %p1495_p9 = scmp.lt.u32.totalorder %s1491_s27, %s1823_s4 }
  0x18   :  { %p1497_p10 = pnand %p1495_p9, %p1492_p8 }
  0x1a   :  { %1500 = shalt.err (!%p1497_p10)
}
  0x1b   :  { %s1501_s12 = scalar_lea.vmem %s58_s24, 8192  ;;  %p1506_p12 = scmp.lt.s32.totalorder %s58_s24, %s58_s24 }
  0x1c   :  { %p1502_p11 = scmp.ne.s32.totalorder %s58_s24, %s1501_s12  ;;  %p1507_p13 = scmp.lt.s32.totalorder %s1501_s12, %s1501_s12 }
  0x1e   :  { %p1508_p0 = por %p1507_p13, %p1506_p12 }
  0x20   :  { %p1509_p1 = pnand %p1508_p0, %p1502_p11 }
  0x22   :  { %1512 = shalt.err (!%p1509_p1)
}
  0x23   :  { %s1613_s1 = smov 128   ;;  %s1614_s10 = smov 8  }
  0x24   :  { %63 = dma.hbm_to_vmem [thread:$0]  %s1823_s4, 8192, %s58_s24, [#allocation9], %s1613_s1, %s1613_s1, %s1614_s10  }
  0x25   :  { %s1615_s15 = smov [#allocation2]   ;;  %s1616_s17 = smov [#allocation7]  }
  0x26   :  { %s24_s16 = sshll.u32 %s1615_s15, 4  ;;  %s48_s18 = sshll.u32 %s1616_s17, 4  ;;  %s25_s16 = int_to_ptr.vmem [resolvable:$true] %s24_s16  ;;  %s49_s18 = int_to_ptr.vmem [resolvable:$true] %s48_s18 }
  0x27   :  { %s1513_s21 = scalar_lea.hbm %s1819_s0, 128 }
  0x28   :  { %p1514_p2 = scmp.ne.s32.totalorder %s1819_s0, %s1513_s21  ;;  %p1517_p3 = scmp.lt.u32.totalorder %s1513_s21, %s1819_s0 }
  0x2a   :  { %p1519_p4 = pnand %p1517_p3, %p1514_p2 }
  0x2c   :  { %1522 = shalt.err (!%p1519_p4)
}
  0x2d   :  { %s1523_s4 = scalar_lea.vmem %s25_s16, 128  ;;  %p1528_p6 = scmp.lt.s32.totalorder %s25_s16, %s25_s16 }
  0x2e   :  { %p1524_p5 = scmp.ne.s32.totalorder %s25_s16, %s1523_s4  ;;  %p1529_p7 = scmp.lt.s32.totalorder %s1523_s4, %s1523_s4 }
  0x30   :  { %p1530_p8 = por %p1529_p7, %p1528_p6 }
  0x32   :  { %p1531_p9 = pnand %p1530_p8, %p1524_p5 }
  0x34   :  { %1534 = shalt.err (!%p1531_p9)
}
  0x35   :  { %27 = dma.hbm_to_vmem [thread:$0]  %s1819_s0, 128, %s25_s16, [#allocation3]  }
  0x36   :  { %s1535_s30 = scalar_lea.hbm %s1822_s3, 64 }
  0x37   :  { %p1536_p10 = scmp.ne.s32.totalorder %s1822_s3, %s1535_s30  ;;  %p1539_p11 = scmp.lt.u32.totalorder %s1535_s30, %s1822_s3 }
  0x39   :  { %p1541_p12 = pnand %p1539_p11, %p1536_p10 }
  0x3b   :  { %1544 = shalt.err (!%p1541_p12)
}
  0x3c   :  { %s1545_s13 = scalar_lea.vmem %s49_s18, 64  ;;  %p1550_p0 = scmp.lt.s32.totalorder %s49_s18, %s49_s18 }
  0x3d   :  { %p1546_p13 = scmp.ne.s32.totalorder %s49_s18, %s1545_s13  ;;  %p1551_p1 = scmp.lt.s32.totalorder %s1545_s13, %s1545_s13 }
  0x3f   :  { %p1552_p2 = por %p1551_p1, %p1550_p0 }
  0x41   :  { %p1553_p3 = pnand %p1552_p2, %p1546_p13 }
  0x43   :  { %1556 = shalt.err (!%p1553_p3)
}
  0x44   :  { %51 = dma.hbm_to_vmem [thread:$0]  %s1822_s3, 64, %s49_s18, [#allocation6]  }
  0x45   :  { %s1617_s15 = smov [#allocation10]   ;;  %s1557_s20 = scalar_lea.hbm %s1826_s7, 2048 }
  0x46   :  { %s73_s16 = sshll.u32 %s1617_s15, 4  ;;  %p1558_p4 = scmp.ne.s32.totalorder %s1826_s7, %s1557_s20  ;;  %s74_s16 = int_to_ptr.vmem [resolvable:$true] %s73_s16 }
  0x47   :  { %p1561_p5 = scmp.lt.u32.totalorder %s1557_s20, %s1826_s7 }
  0x49   :  { %p1563_p6 = pnand %p1561_p5, %p1558_p4 }
  0x4b   :  { %1566 = shalt.err (!%p1563_p6)
}
  0x4c   :  { %s1567_s26 = scalar_lea.vmem %s74_s16, 2048  ;;  %p1572_p8 = scmp.lt.s32.totalorder %s74_s16, %s74_s16 }
  0x4d   :  { %p1568_p7 = scmp.ne.s32.totalorder %s74_s16, %s1567_s26  ;;  %p1573_p9 = scmp.lt.s32.totalorder %s1567_s26, %s1567_s26 }
  0x4f   :  { %p1574_p10 = por %p1573_p9, %p1572_p8 }
  0x51   :  { %p1575_p11 = pnand %p1574_p10, %p1568_p7 }
  0x53   :  { %1578 = shalt.err (!%p1575_p11)
}
  0x54   :  { %s1618_s3 = smov 64   ;;  %s1619_s18 = smov 4  }
  0x55   :  { %79 = dma.hbm_to_vmem [thread:$0]  %s1826_s7, 2048, %s74_s16, [#allocation9], %s1618_s3, %s1618_s3, %s1619_s18  }
  0x56   :  { %1601 = dma.done.wait [#allocation3], 128  }
  0x57   :  { %1602 = vsyncadd [#allocation3], 4294967168 }
  0x58   :  { %1603 = dma.done.wait [#allocation6], 1088  }
  0x59   :  { %1604 = vsyncadd [#allocation6], 4294966208 }
  0x5a   :  { %1605 = dma.done.wait [#allocation9], 10240  }
  0x5b   :  { %1606 = vsyncadd [#allocation9], 4294957056  ;;  %v1620_v0 = vmov 0   ;;  %v1333_v1 = vld [vmem:[#allocation5 + $0x4] ss:$16 sps:$4 sm:$0xff]   ;;  %v98_v5 = vld [vmem:[#allocation2] sm:$0xff] }
  0x5c   :  { %184 = vmatprep.mubr.bf16.mxu0 %v1620_v0  ;;  %v1335_v2 = vld [vmem:[#allocation5] ss:$16 sps:$4 sm:$0xff]   ;;  %152 = vmatprep.subr.bf16.mxu0 %v1333_v1  ;;  %v1336_v3 = vld [vmem:[#allocation5 + $0x24] ss:$16 sps:$4 sm:$0xff]   ;;  %v1341_v6 = vld [vmem:[#allocation5 + $0xc] ss:$16 sps:$4 sm:$0xff]   ;;  %v99_v8 = vpack.c.bf16 %v98_v5, %v98_v5 }
  0x5d   :  { %v1338_v4 = vld [vmem:[#allocation5 + $0x20] ss:$16 sps:$4 sm:$0xff]   ;;  %153 = vmatpush1.bf16.msra.mxu0 %v1335_v2  ;;  %v1339_v7 = vld [vmem:[#allocation5 + $0x8] ss:$16 sps:$4 sm:$0xff]   ;;  %v1344_v9 = vld [vmem:[#allocation5 + $0x2c] ss:$16 sps:$4 sm:$0xff]  }
  0x5e   :  { %154 = vmatprep.subr.bf16.mxu0 %v1336_v3  ;;  %vm148_vm0 = vcmask 261120   ;;  %v1342_v10 = vld [vmem:[#allocation5 + $0x28] ss:$16 sps:$4 sm:$0xff]   ;;  %v1347_v13 = vld [vmem:[#allocation8 + $0x100] ss:$8 sps:$4 sm:$0xff]  }
  0x5f   :  { %v1345_v11 = vld [vmem:[#allocation8 + $0x4] ss:$8 sps:$4 sm:$0xff]   ;;  %v1350_v14 = vld [vmem:[#allocation8] ss:$8 sps:$4 sm:$0xff]   ;;  %v1351_v15 = vld [vmem:[#allocation8 + $0x14] ss:$8 sps:$4 sm:$0xff]  }
  0x60   :  { %v1349_v12 = vld [vmem:[#allocation8 + $0x104] ss:$8 sps:$4 sm:$0xff]   ;;  %819 = vmatprep.subr.bf16.mxu1 %v1345_v11  ;;  %v1355_v16 = vld [vmem:[#allocation8 + $0x114] ss:$8 sps:$4 sm:$0xff]   ;;  %v1353_v17 = vld [vmem:[#allocation8 + $0x110] ss:$8 sps:$4 sm:$0xff]  }
  0x61   :  { %155 = vmatpush1.bf16.msra.mxu0 %v1338_v4  ;;  %820 = vmatpush1.bf16.msra.mxu1 %v1350_v14  ;;  %v1356_v18 = vld [vmem:[#allocation8 + $0x10] ss:$8 sps:$4 sm:$0xff]   ;;  %v1357_v19 = vld [vmem:[#allocation8 + $0x24] ss:$8 sps:$4 sm:$0xff]   ;;  %v1359_v21 = vld [vmem:[#allocation8 + $0x120] ss:$8 sps:$4 sm:$0xff]  }
  0x62   :  { %193 = vmatprep.subr.bf16.mxu0 %v1341_v6  ;;  %821 = vmatprep.subr.bf16.mxu1 %v1351_v15  ;;  %v1361_v20 = vld [vmem:[#allocation8 + $0x124] ss:$8 sps:$4 sm:$0xff]   ;;  %v1362_v22 = vld [vmem:[#allocation8 + $0x20] ss:$8 sps:$4 sm:$0xff]   ;;  %v1363_v23 = vld [vmem:[#allocation8 + $0x34] ss:$8 sps:$4 sm:$0xff]  }
  0x63   :  { %v1367_v24 = vld [vmem:[#allocation8 + $0x134] ss:$8 sps:$4 sm:$0xff]   ;;  %v1365_v25 = vld [vmem:[#allocation8 + $0x130] ss:$8 sps:$4 sm:$0xff]   ;;  %v1369_v27 = vld [vmem:[#allocation8 + $0x44] ss:$8 sps:$4 sm:$0xff]  }
  0x64   :  { %1212 = vmatmul.mubr.msk.bf16.vlgmr.msra.gmra.mrb[0].mxu0 %vm148_vm0, %v99_v8  ;;  %v1368_v26 = vld [vmem:[#allocation8 + $0x30] ss:$8 sps:$4 sm:$0xff]   ;;  %v1373_v28 = vld [vmem:[#allocation8 + $0x144] ss:$8 sps:$4 sm:$0xff]   ;;  %v1371_v29 = vld [vmem:[#allocation8 + $0x140] ss:$8 sps:$4 sm:$0xff]  }
  0x65   :  { %194 = vmatpush1.bf16.msra.mxu0 %v1339_v7  ;;  %225 = vmatprep.mubr.bf16.mxu0 %v1620_v0  ;;  %v1374_v30 = vld [vmem:[#allocation8 + $0x40] ss:$8 sps:$4 sm:$0xff]   ;;  %v1375_v31 = vld [vmem:[#allocation8 + $0x54] ss:$8 sps:$4 sm:$0xff]   ;;  %v1377_v33 = vld [vmem:[#allocation8 + $0x150] ss:$8 sps:$4 sm:$0xff]  }
  0x66   :  { %195 = vmatprep.subr.bf16.mxu0 %v1344_v9  ;;  %822 = vmatpush1.bf16.msra.mxu1 %v1356_v18  ;;  %v1379_v32 = vld [vmem:[#allocation8 + $0x154] ss:$8 sps:$4 sm:$0xff]   ;;  %v1380_v34 = vld [vmem:[#allocation8 + $0x50] ss:$8 sps:$4 sm:$0xff]   ;;  %v1381_v35 = vld [vmem:[#allocation8 + $0x64] ss:$8 sps:$4 sm:$0xff]  }
  0x67   :  { %823 = vmatprep.subr.bf16.mxu1 %v1357_v19  ;;  %v1385_v36 = vld [vmem:[#allocation8 + $0x164] ss:$8 sps:$4 sm:$0xff]   ;;  %v1383_v37 = vld [vmem:[#allocation8 + $0x160] ss:$8 sps:$4 sm:$0xff]   ;;  %v1387_v39 = vld [vmem:[#allocation8 + $0x74] ss:$8 sps:$4 sm:$0xff]  }
  0x68   :  { %v1386_v38 = vld [vmem:[#allocation8 + $0x60] ss:$8 sps:$4 sm:$0xff]   ;;  %v1391_v40 = vld [vmem:[#allocation8 + $0x174] ss:$8 sps:$4 sm:$0xff]   ;;  %v1389_v41 = vld [vmem:[#allocation8 + $0x170] ss:$8 sps:$4 sm:$0xff]  }
  0x69   :  { %196 = vmatpush1.bf16.msra.mxu0 %v1342_v10  ;;  %v1392_v42 = vld [vmem:[#allocation8 + $0x70] ss:$8 sps:$4 sm:$0xff]   ;;  %v1393_v43 = vld [vmem:[#allocation8 + $0x84] ss:$8 sps:$4 sm:$0xff]   ;;  %v1395_v45 = vld [vmem:[#allocation8 + $0x180] ss:$8 sps:$4 sm:$0xff]  }
  0x6a   :  { %860 = vmatprep.subr.bf16.mxu0 %v1349_v12  ;;  %824 = vmatpush1.bf16.msra.mxu1 %v1362_v22  ;;  %v1397_v44 = vld [vmem:[#allocation8 + $0x184] ss:$8 sps:$4 sm:$0xff]   ;;  %v1398_v46 = vld [vmem:[#allocation8 + $0x80] ss:$8 sps:$4 sm:$0xff]   ;;  %v1399_v47 = vld [vmem:[#allocation8 + $0x94] ss:$8 sps:$4 sm:$0xff]  }
  0x6b   :  { %825 = vmatprep.subr.bf16.mxu1 %v1363_v23  ;;  %v1403_v48 = vld [vmem:[#allocation8 + $0x194] ss:$8 sps:$4 sm:$0xff]   ;;  %v1401_v49 = vld [vmem:[#allocation8 + $0x190] ss:$8 sps:$4 sm:$0xff]   ;;  %v1405_v51 = vld [vmem:[#allocation8 + $0xa4] ss:$8 sps:$4 sm:$0xff]  }
  0x6c   :  { %1213 = vmatmul.mubr.msk.bf16.vlgmr.msra.gmra.mrb[4].mxu0 %vm148_vm0, %v99_v8  ;;  %v1404_v50 = vld [vmem:[#allocation8 + $0x90] ss:$8 sps:$4 sm:$0xff]   ;;  %v1409_v52 = vld [vmem:[#allocation8 + $0x1a4] ss:$8 sps:$4 sm:$0xff]   ;;  %v1407_v53 = vld [vmem:[#allocation8 + $0x1a0] ss:$8 sps:$4 sm:$0xff]  }
  0x6d   :  { %861 = vmatpush1.bf16.msra.mxu0 %v1347_v13  ;;  %v1410_v54 = vld [vmem:[#allocation8 + $0xa0] ss:$8 sps:$4 sm:$0xff]   ;;  %v1411_v55 = vld [vmem:[#allocation8 + $0xb4] ss:$8 sps:$4 sm:$0xff]   ;;  %v1413_v57 = vld [vmem:[#allocation8 + $0x1b0] ss:$8 sps:$4 sm:$0xff]  }
  0x6e   :  { %862 = vmatprep.subr.bf16.mxu0 %v1355_v16  ;;  %826 = vmatpush1.bf16.msra.mxu1 %v1368_v26  ;;  %v1415_v56 = vld [vmem:[#allocation8 + $0x1b4] ss:$8 sps:$4 sm:$0xff]   ;;  %v1416_v58 = vld [vmem:[#allocation8 + $0xb0] ss:$8 sps:$4 sm:$0xff]   ;;  %v1417_v59 = vld [vmem:[#allocation8 + $0xc4] ss:$8 sps:$4 sm:$0xff]  }
  0x6f   :  { %827 = vmatprep.subr.bf16.mxu1 %v1369_v27  ;;  %v1421_v60 = vld [vmem:[#allocation8 + $0x1c4] ss:$8 sps:$4 sm:$0xff]   ;;  %v1419_v61 = vld [vmem:[#allocation8 + $0x1c0] ss:$8 sps:$4 sm:$0xff]   ;;  %v1423_v63 = vld [vmem:[#allocation8 + $0xd4] ss:$8 sps:$4 sm:$0xff]  }
  0x70   :  { %v1422_v62 = vld [vmem:[#allocation8 + $0xc0] ss:$8 sps:$4 sm:$0xff]   ;;  %v1427_v0 = vld [vmem:[#allocation8 + $0x1d4] ss:$8 sps:$4 sm:$0xff]   ;;  %v1425_v1 = vld [vmem:[#allocation8 + $0x1d0] ss:$8 sps:$4 sm:$0xff]  }
  0x71   :  { %863 = vmatpush1.bf16.msra.mxu0 %v1353_v17  ;;  %v1428_v2 = vld [vmem:[#allocation8 + $0xd0] ss:$8 sps:$4 sm:$0xff]   ;;  %v1429_v3 = vld [vmem:[#allocation8 + $0xe4] ss:$8 sps:$4 sm:$0xff]   ;;  %v1431_v5 = vld [vmem:[#allocation8 + $0x1e0] ss:$8 sps:$4 sm:$0xff]  }
  0x72   :  { %864 = vmatprep.subr.bf16.mxu0 %v1361_v20  ;;  %828 = vmatpush1.bf16.msra.mxu1 %v1374_v30  ;;  %v1433_v4 = vld [vmem:[#allocation8 + $0x1e4] ss:$8 sps:$4 sm:$0xff]   ;;  %v1434_v6 = vld [vmem:[#allocation8 + $0xe0] ss:$8 sps:$4 sm:$0xff]   ;;  %v1435_v7 = vld [vmem:[#allocation8 + $0xf4] ss:$8 sps:$4 sm:$0xff]  }
  0x73   :  { %829 = vmatprep.subr.bf16.mxu1 %v1375_v31  ;;  %v1439_v8 = vld [vmem:[#allocation8 + $0x1f4] ss:$8 sps:$4 sm:$0xff]   ;;  %v1437_v9 = vld [vmem:[#allocation8 + $0x1f0] ss:$8 sps:$4 sm:$0xff]  }
  0x74   :  { %v1440_v10 = vld [vmem:[#allocation8 + $0xf0] ss:$8 sps:$4 sm:$0xff]  }
  0x75   :  { %865 = vmatpush1.bf16.msra.mxu0 %v1359_v21 }
  0x76   :  { %866 = vmatprep.subr.bf16.mxu0 %v1367_v24  ;;  %830 = vmatpush1.bf16.msra.mxu1 %v1380_v34 }
  0x77   :  { %831 = vmatprep.subr.bf16.mxu1 %v1381_v35 }
  0x79   :  { %867 = vmatpush1.bf16.msra.mxu0 %v1365_v25 }
  0x7a   :  { %868 = vmatprep.subr.bf16.mxu0 %v1373_v28  ;;  %832 = vmatpush1.bf16.msra.mxu1 %v1386_v38 }
  0x7b   :  { %833 = vmatprep.subr.bf16.mxu1 %v1387_v39 }
  0x7d   :  { %869 = vmatpush1.bf16.msra.mxu0 %v1371_v29 }
  0x7e   :  { %870 = vmatprep.subr.bf16.mxu0 %v1379_v32  ;;  %834 = vmatpush1.bf16.msra.mxu1 %v1392_v42 }
  0x7f   :  { %835 = vmatprep.subr.bf16.mxu1 %v1393_v43 }
  0x81   :  { %871 = vmatpush1.bf16.msra.mxu0 %v1377_v33 }
  0x82   :  { %872 = vmatprep.subr.bf16.mxu0 %v1385_v36  ;;  %836 = vmatpush1.bf16.msra.mxu1 %v1398_v46 }
  0x83   :  { %837 = vmatprep.subr.bf16.mxu1 %v1399_v47 }
  0x85   :  { %873 = vmatpush1.bf16.msra.mxu0 %v1383_v37 }
  0x86   :  { %874 = vmatprep.subr.bf16.mxu0 %v1391_v40  ;;  %838 = vmatpush1.bf16.msra.mxu1 %v1404_v50 }
  0x87   :  { %839 = vmatprep.subr.bf16.mxu1 %v1405_v51 }
  0x89   :  { %875 = vmatpush1.bf16.msra.mxu0 %v1389_v41 }
  0x8a   :  { %876 = vmatprep.subr.bf16.mxu0 %v1397_v44  ;;  %840 = vmatpush1.bf16.msra.mxu1 %v1410_v54 }
  0x8b   :  { %841 = vmatprep.subr.bf16.mxu1 %v1411_v55 }
  0x8d   :  { %877 = vmatpush1.bf16.msra.mxu0 %v1395_v45 }
  0x8e   :  { %878 = vmatprep.subr.bf16.mxu0 %v1403_v48  ;;  %842 = vmatpush1.bf16.msra.mxu1 %v1416_v58 }
  0x8f   :  { %843 = vmatprep.subr.bf16.mxu1 %v1417_v59 }
  0x91   :  { %879 = vmatpush1.bf16.msra.mxu0 %v1401_v49 }
  0x92   :  { %880 = vmatprep.subr.bf16.mxu0 %v1409_v52  ;;  %844 = vmatpush1.bf16.msra.mxu1 %v1422_v62 }
  0x93   :  { %845 = vmatprep.subr.bf16.mxu1 %v1423_v63 }
  0x95   :  { %881 = vmatpush1.bf16.msra.mxu0 %v1407_v53 }
  0x96   :  { %882 = vmatprep.subr.bf16.mxu0 %v1415_v56  ;;  %846 = vmatpush1.bf16.msra.mxu1 %v1428_v2 }
  0x97   :  { %847 = vmatprep.subr.bf16.mxu1 %v1429_v3 }
  0x99   :  { %883 = vmatpush1.bf16.msra.mxu0 %v1413_v57 }
  0x9a   :  { %884 = vmatprep.subr.bf16.mxu0 %v1421_v60  ;;  %848 = vmatpush1.bf16.msra.mxu1 %v1434_v6 }
  0x9b   :  { %849 = vmatprep.subr.bf16.mxu1 %v1435_v7 }
  0x9d   :  { %885 = vmatpush1.bf16.msra.mxu0 %v1419_v61 }
  0x9e   :  { %886 = vmatprep.subr.bf16.mxu0 %v1427_v0  ;;  %850 = vmatpush1.bf16.msra.mxu1 %v1440_v10 }
  0xa1   :  { %887 = vmatpush1.bf16.msra.mxu0 %v1425_v1 }
  0xa2   :  { %888 = vmatprep.subr.bf16.mxu0 %v1433_v4 }
  0xa5   :  { %889 = vmatpush1.bf16.msra.mxu0 %v1431_v5 }
  0xa6   :  { %890 = vmatprep.subr.bf16.mxu0 %v1439_v8 }
  0xa9   :  { %891 = vmatpush1.bf16.msra.mxu0 %v1437_v9 }
 0x137   :  { %v1733_v11 = vpop.f32.mrb[0].mxu0 }
 0x138   :  { %v234_v12 = vrot.slane %v1733_v11, 4  ;;  %v263_v13 = vmul.f32 %v1733_v11, %v1733_v11  ;;  %v1738_v14 = vpop.f32.mrb[1].mxu0 }
 0x139   :  { %v240_v15 = vrot.slane %v1738_v14, 4  ;;  %v264_v16 = vmul.f32 %v1738_v14, %v1738_v14  ;;  %v190_v17 = vpop.f32.mrb[2].mxu0 }
 0x13a   :  { %v235_v18 = vadd.f32 %v234_v12, %v1733_v11  ;;  %v267_v19 = vrot.slane %v263_v13, 4  ;;  %v191_v20 = vpop.f32.mrb[3].mxu0 }
 0x13b   :  { %v241_v21 = vadd.f32 %v240_v15, %v1738_v14  ;;  %v273_v22 = vrot.slane %v264_v16, 4 }
 0x13c   :  { %v236_v23 = vrot.slane %v235_v18, 2  ;;  %v268_v24 = vadd.f32 %v267_v19, %v263_v13 }
 0x13d   :  { %v242_v25 = vrot.slane %v241_v21, 2  ;;  %v274_v26 = vadd.f32 %v273_v22, %v264_v16 }
 0x13e   :  { %v237_v27 = vadd.f32 %v236_v23, %v235_v18  ;;  %v269_v28 = vrot.slane %v268_v24, 2 }
 0x13f   :  { %v243_v29 = vadd.f32 %v242_v25, %v241_v21  ;;  %v275_v30 = vrot.slane %v274_v26, 2  ;;  %v1745_v31 = vpop.f32.mrb[4].mxu0 }
 0x140   :  { %v238_v32 = vrot.slane %v237_v27, 1  ;;  %v270_v33 = vadd.f32 %v269_v28, %v268_v24  ;;  %v246_v34 = vrot.slane %v1745_v31, 4  ;;  %v265_v35 = vmul.f32 %v1745_v31, %v1745_v31  ;;  %v1750_v36 = vpop.f32.mrb[5].mxu0 }
 0x141   :  { %v244_v37 = vrot.slane %v243_v29, 1  ;;  %v276_v38 = vadd.f32 %v275_v30, %v274_v26  ;;  %v252_v39 = vrot.slane %v1750_v36, 4  ;;  %v266_v40 = vmul.f32 %v1750_v36, %v1750_v36  ;;  %v231_v41 = vpop.f32.mrb[6].mxu0 }
 0x142   :  { %v239_v42 = vadd.f32 %v238_v32, %v237_v27  ;;  %v271_v43 = vrot.slane %v270_v33, 1  ;;  %v247_v44 = vadd.f32 %v246_v34, %v1745_v31  ;;  %v279_v45 = vrot.slane %v265_v35, 4  ;;  %v232_v46 = vpop.f32.mrb[7].mxu0 }
 0x143   :  { %v245_v47 = vadd.f32 %v244_v37, %v243_v29  ;;  %v277_v48 = vrot.slane %v276_v38, 1  ;;  %v253_v49 = vadd.f32 %v252_v39, %v1750_v36  ;;  %v285_v50 = vrot.slane %v266_v40, 4  ;;  %v295_v46 = vld [vmem:[%s1821_s2] sm:$0xf] }
 0x144   :  { %v1757_v51 = vmul.f32 0.125, %v239_v42  ;;  %v272_v52 = vadd.f32 %v271_v43, %v270_v33  ;;  %v248_v53 = vrot.slane %v247_v44, 2  ;;  %v280_v54 = vadd.f32 %v279_v45, %v265_v35 }
 0x145   :  { %v1759_v55 = vmul.f32 0.125, %v245_v47  ;;  %v278_v56 = vadd.f32 %v277_v48, %v276_v38  ;;  %v254_v57 = vrot.slane %v253_v49, 2  ;;  %v286_v58 = vadd.f32 %v285_v50, %v266_v40 }
 0x146   :  { %v291_v59 = vmul.f32 0.125, %v272_v52  ;;  %v296_v60 = vmul.f32 %v1757_v51, %v1757_v51  ;;  %v249_v61 = vadd.f32 %v248_v53, %v247_v44  ;;  %v281_v62 = vrot.slane %v280_v54, 2 }
 0x147   :  { %v292_v63 = vmul.f32 0.125, %v278_v56  ;;  %v297_v0 = vmul.f32 %v1759_v55, %v1759_v55  ;;  %v255_v1 = vadd.f32 %v254_v57, %v253_v49  ;;  %v287_v2 = vrot.slane %v286_v58, 2 }
 0x148   :  { %v300_v3 = vsub.f32 %v291_v59, %v296_v60  ;;  %v250_v4 = vrot.slane %v249_v61, 1  ;;  %v282_v5 = vadd.f32 %v281_v62, %v280_v54  ;;  %v1621_v30 = vmov 1966171168  }
 0x149   :  { %v301_v6 = vsub.f32 %v292_v63, %v297_v0  ;;  %v256_v7 = vrot.slane %v255_v1, 1  ;;  %v288_v8 = vadd.f32 %v287_v2, %v286_v58  ;;  %v319_v32 = vunpack.c.l.s4 %v1621_v30  ;;  %v1448_v30 = vld [vmem:[#allocation10 + $0x18] sm:$0xff]  }
 0x14a   :  { %v304_v9 = vadd.f32 1e-05, %v300_v3  ;;  %v251_v10 = vadd.f32 %v250_v4, %v249_v61  ;;  %v283_v12 = vrot.slane %v282_v5, 1  ;;  %v321_v33 = vlaneseq }
 0x14b   :  { %v305_v13 = vadd.f32 1e-05, %v301_v6  ;;  %v257_v15 = vadd.f32 %v256_v7, %v255_v1  ;;  %v289_v16 = vrot.slane %v288_v8, 1  ;;  %v320_v37 = vunpack.c.0.s8 %v319_v32  ;;  %v1449_v32 = vld [vmem:[#allocation10 + $0x60] sm:$0xff]  }
 0x14c   :  { %1457 = vrsqrt.f32 %v304_v9  ;;  %v261_v17 = vmul.f32 0.125, %v251_v10  ;;  %v284_v18 = vadd.f32 %v283_v12, %v282_v5  ;;  %v322_v38 = vshrl.u32 %v321_v33, 7  ;;  %v1450_v33 = vld [vmem:[#allocation10 + $0x20] sm:$0xff]  }
 0x14d   :  { %1459 = vrsqrt.f32 %v305_v13  ;;  %v262_v19 = vmul.f32 0.125, %v257_v15  ;;  %v290_v20 = vadd.f32 %v289_v16, %v288_v8  ;;  %v342_v8 = vld [vmem:[#allocation7] sm:$0xf] }
 0x14e   :  { %v293_v21 = vmul.f32 0.125, %v284_v18  ;;  %v298_v22 = vmul.f32 %v261_v17, %v261_v17  ;;  %v1765_v40 = vsub.s32 %v320_v37, %v322_v38  ;;  %v354_v47 = vsub.s32 2, %v322_v38  ;;  %v1453_v37 = vld [vmem:[#allocation10 + $0x70] sm:$0xff]  }
 0x14f   :  { %v294_v23 = vmul.f32 0.125, %v290_v20  ;;  %v299_v24 = vmul.f32 %v262_v19, %v262_v19  ;;  %v358_v49 = vsub.s32 3, %v322_v38  ;;  %v1773_v50 = vsub.s32 0, %v322_v38 }
 0x150   :  { %v302_v25 = vsub.f32 %v293_v21, %v298_v22  ;;  %v1775_v52 = vsub.s32 1, %v322_v38  ;;  %v1454_v38 = vld [vmem:[#allocation10 + $0x30] sm:$0xff]  }
 0x151   :  { %v303_v26 = vsub.f32 %v294_v23, %v299_v24  ;;  %v1441_v23 = vld [vmem:[#allocation10 + $0x40] sm:$0xff]  }
 0x152   :  { %v306_v27 = vadd.f32 1e-05, %v302_v25  ;;  %v1442_v24 = vld [vmem:[#allocation10] sm:$0xff]   ;;  %v1443_v25 = vld [vmem:[#allocation10 + $0x48] sm:$0xff]   ;;  %1295 = vmatprep.subr.bf16.mxu1 %v1441_v23 }
 0x153   :  { %v307_v28 = vadd.f32 1e-05, %v303_v26  ;;  %v1444_v26 = vld [vmem:[#allocation10 + $0x8] sm:$0xff]  }
 0x154   :  { %1461 = vrsqrt.f32 %v306_v27  ;;  %v1445_v27 = vld [vmem:[#allocation10 + $0x50] sm:$0xff]  }
 0x155   :  { %1463 = vrsqrt.f32 %v307_v28  ;;  %v1446_v28 = vld [vmem:[#allocation10 + $0x10] sm:$0xff]  }
 0x156   :  { %v1458_v29 = vpop.eup %1457 }
 0x157   :  { %v1460_v34 = vpop.eup %1459 }
 0x158   :  { %v316_v35 = vcombine.low %v1458_v29, %v1460_v34  ;;  %v1447_v29 = vld [vmem:[#allocation10 + $0x58] sm:$0xff]   ;;  %v1451_v34 = vld [vmem:[#allocation10 + $0x68] sm:$0xff]  }
 0x15a   :  { %v324_v43 = vrot.slane %v316_v35, %v1765_v40  ;;  %v1452_v35 = vld [vmem:[#allocation10 + $0x28] sm:$0xff]  }
 0x15e   :  { %v1462_v39 = vpop.eup %1461 }
 0x15f   :  { %v1464_v41 = vpop.eup %1463 }
 0x160   :  { %v317_v42 = vcombine.low %v1462_v39, %v1464_v41  ;;  %v1455_v39 = vld [vmem:[#allocation10 + $0x78] sm:$0xff]  }
 0x161   :  { %v1456_v41 = vld [vmem:[#allocation10 + $0x38] sm:$0xff]  }
 0x162   :  { %v331_v44 = vrot.slane %v317_v42, %v1765_v40 }
 0x164   :  { %v332_v45 = vcombine.low %v324_v43, %v331_v44 }
 0x166   :  { %v339_v48 = vrot.slane %v332_v45, %v1765_v40 }
 0x168   :  { %v341_v53 = vmul.f32 %v339_v48, %v295_v46 }
 0x16a   :  { %v355_v54 = vrot.slane %v341_v53, %v354_v47  ;;  %v359_v56 = vrot.slane %v341_v53, %v358_v49  ;;  %v347_v57 = vrot.slane %v341_v53, %v1773_v50  ;;  %v351_v58 = vrot.slane %v341_v53, %v1775_v52 }
 0x16c   :  { %v366_v59 = vmul.f32 %v355_v54, %v261_v17  ;;  %v367_v60 = vmul.f32 %v359_v56, %v262_v19  ;;  %v401_v61 = vmul.f32 %v359_v56, %v1750_v36  ;;  %v364_v62 = vmul.f32 %v347_v57, %v1757_v51 }
 0x16d   :  { %v365_v63 = vmul.f32 %v351_v58, %v1759_v55  ;;  %v399_v0 = vmul.f32 %v351_v58, %v1738_v14  ;;  %v398_v1 = vmul.f32 %v347_v57, %v1733_v11  ;;  %v400_v2 = vmul.f32 %v355_v54, %v1745_v31 }
 0x16e   :  { %v373_v3 = vcombine.low %v366_v59, %v367_v60 }
 0x16f   :  { %v372_v4 = vcombine.low %v364_v62, %v365_v63 }
 0x170   :  { %v387_v5 = vrot.slane %v373_v3, %v1765_v40 }
 0x171   :  { %v380_v6 = vrot.slane %v372_v4, %v1765_v40 }
 0x173   :  { %v388_v7 = vcombine.low %v380_v6, %v387_v5 }
 0x175   :  { %v395_v36 = vrot.slane %v388_v7, %v1765_v40 }
 0x177   :  { %v397_v9 = vsub.f32 %v342_v8, %v395_v36 }
 0x179   :  { %v410_v51 = vrot.slane %v397_v9, %v1775_v52  ;;  %v418_v55 = vrot.slane %v397_v9, %v358_v49  ;;  %v406_v14 = vrot.slane %v397_v9, %v1773_v50  ;;  %v414_v10 = vrot.slane %v397_v9, %v354_v47 }
 0x17b   :  { %v424_v11 = vadd.f32 %v410_v51, %v399_v0  ;;  %v426_v12 = vadd.f32 %v418_v55, %v401_v61  ;;  %v423_v31 = vadd.f32 %v406_v14, %v398_v1  ;;  %v425_v13 = vadd.f32 %v414_v10, %v400_v2 }
 0x17d   :  { %v428_v15 = vmax.f32 %v424_v11, 0.0  ;;  %v430_v16 = vmax.f32 %v426_v12, 0.0  ;;  %v427_v17 = vmax.f32 %v423_v31, 0.0  ;;  %v429_v18 = vmax.f32 %v425_v13, 0.0 }
 0x17f   :  { %v432_v19 = vpack.c.bf16 %v428_v15, %v428_v15  ;;  %v434_v20 = vpack.c.bf16 %v430_v16, %v430_v16  ;;  %v431_v21 = vpack.c.bf16 %v427_v17, %v427_v17  ;;  %v433_v22 = vpack.c.bf16 %v429_v18, %v429_v18 }
 0x181   :  { %851 = vmatprep.mubr.bf16.mxu1 %v432_v19  ;;  %892 = vmatprep.mubr.bf16.mxu0 %v434_v20 }
 0x182   :  { %852 = vmatmul.mubr.bf16.vlgmr.msra.gmra.mrb[0].mxu1 %v431_v21  ;;  %893 = vmatmul.mubr.bf16.vlgmr.msra.gmra.mrb[8].mxu0 %v433_v22 }
 0x183   :  { %1296 = vmatpush3.bf16.msra.mxu1 %v1442_v24 }
 0x184   :  { %1297 = vmatprep.subr.bf16.mxu1 %v1443_v25 }
 0x187   :  { %1298 = vmatpush3.bf16.msra.mxu1 %v1444_v26 }
 0x188   :  { %1299 = vmatprep.subr.bf16.mxu1 %v1445_v27 }
 0x18b   :  { %1300 = vmatpush3.bf16.msra.mxu1 %v1446_v28  ;;  %v931_v28 = vld [vmem:[%s1824_s5] sm:$0x3] }
 0x18c   :  { %1301 = vmatprep.subr.bf16.mxu1 %v1447_v29 }
 0x18f   :  { %1302 = vmatpush3.bf16.msra.mxu1 %v1448_v30 }
 0x190   :  { %1303 = vmatprep.subr.bf16.mxu1 %v1449_v32 }
 0x193   :  { %1304 = vmatpush3.bf16.msra.mxu1 %v1450_v33 }
 0x194   :  { %1305 = vmatprep.subr.bf16.mxu1 %v1451_v34 }
 0x197   :  { %1306 = vmatpush3.bf16.msra.mxu1 %v1452_v35 }
 0x198   :  { %1307 = vmatprep.subr.bf16.mxu1 %v1453_v37 }
 0x19b   :  { %1308 = vmatpush3.bf16.msra.mxu1 %v1454_v38 }
 0x19c   :  { %1309 = vmatprep.subr.bf16.mxu1 %v1455_v39 }
 0x19f   :  { %1310 = vmatpush3.bf16.msra.mxu1 %v1456_v41 }
 0x255   :  { %v853_v42 = vpop.f32.mrb[0].mxu1  ;;  %v894_v43 = vpop.f32.mrb[8].mxu0 }
 0x256   :  { %v895_v44 = vadd.f32 %v894_v43, %v853_v42  ;;  %v855_v45 = vpop.f32.mrb[1].mxu1  ;;  %v896_v46 = vpop.f32.mrb[9].mxu0  ;;  %v959_v42 = vld [vmem:[%s1825_s6] sm:$0x3]  ;;  %s1622_s6 = smov [#allocation11]  }
 0x257   :  { %v897_v47 = vadd.f32 %v896_v46, %v855_v45  ;;  %v857_v48 = vpop.f32.mrb[2].mxu1  ;;  %v898_v49 = vpop.f32.mrb[10].mxu0  ;;  %s1193_s12 = sshll.u32 %s1622_s6, 4  ;;  %s1194_s12 = int_to_ptr.vmem [resolvable:$true] %s1193_s12 }
 0x258   :  { %v901_v53 = vrot.slane %v895_v44, 4  ;;  %v915_v54 = vmul.f32 %v895_v44, %v895_v44  ;;  %v858_v56 = vpop.f32.mrb[3].mxu1  ;;  %v899_v57 = vpop.f32.mrb[11].mxu0  ;;  %s1579_s1 = scalar_lea.vmem %s1194_s12, 128  ;;  %p1584_p13 = scmp.lt.s32.totalorder %s1194_s12, %s1194_s12 }
 0x259   :  { %v907_v58 = vrot.slane %v897_v47, 4  ;;  %v916_v59 = vmul.f32 %v897_v47, %v897_v47  ;;  %p1580_p12 = scmp.ne.s32.totalorder %s1194_s12, %s1579_s1  ;;  %p1585_p0 = scmp.lt.s32.totalorder %s1579_s1, %s1579_s1 }
 0x25a   :  { %v902_v60 = vadd.f32 %v901_v53, %v895_v44  ;;  %v917_v61 = vrot.slane %v915_v54, 4 }
 0x25b   :  { %v908_v62 = vadd.f32 %v907_v58, %v897_v47  ;;  %v923_v63 = vrot.slane %v916_v59, 4  ;;  %v1278_v58 = vld [vmem:[%s1827_s8] ss:$0 sm:$0xff]  ;;  %p1586_p1 = por %p1585_p0, %p1584_p13 }
 0x25c   :  { %v903_v0 = vrot.slane %v902_v60, 2  ;;  %v918_v1 = vadd.f32 %v917_v61, %v915_v54 }
 0x25d   :  { %v909_v2 = vrot.slane %v908_v62, 2  ;;  %v924_v3 = vadd.f32 %v923_v63, %v916_v59  ;;  %p1587_p2 = pnand %p1586_p1, %p1580_p12 }
 0x25e   :  { %v904_v4 = vadd.f32 %v903_v0, %v902_v60  ;;  %v919_v5 = vrot.slane %v918_v1, 2 }
 0x25f   :  { %v910_v6 = vadd.f32 %v909_v2, %v908_v62  ;;  %v925_v7 = vrot.slane %v924_v3, 2 }
 0x260   :  { %v905_v8 = vrot.slane %v904_v4, 1  ;;  %v920_v36 = vadd.f32 %v919_v5, %v918_v1 }
 0x261   :  { %v911_v9 = vrot.slane %v910_v6, 1  ;;  %v926_v51 = vadd.f32 %v925_v7, %v924_v3 }
 0x262   :  { %v906_v55 = vadd.f32 %v905_v8, %v904_v4  ;;  %v921_v14 = vrot.slane %v920_v36, 1 }
 0x263   :  { %v912_v10 = vadd.f32 %v911_v9, %v910_v6  ;;  %v927_v11 = vrot.slane %v926_v51, 1 }
 0x264   :  { %v913_v12 = vmul.f32 0.125, %v906_v55  ;;  %v922_v31 = vadd.f32 %v921_v14, %v920_v36 }
 0x265   :  { %v928_v13 = vadd.f32 %v927_v11, %v926_v51  ;;  %v914_v15 = vmul.f32 0.125, %v912_v10 }
 0x266   :  { %v929_v16 = vmul.f32 0.125, %v922_v31  ;;  %v932_v17 = vmul.f32 %v913_v12, %v913_v12 }
 0x267   :  { %v930_v18 = vmul.f32 0.125, %v928_v13  ;;  %v933_v19 = vmul.f32 %v914_v15, %v914_v15 }
 0x268   :  { %v934_v20 = vsub.f32 %v929_v16, %v932_v17 }
 0x269   :  { %v935_v21 = vsub.f32 %v930_v18, %v933_v19 }
 0x26a   :  { %v936_v22 = vadd.f32 1e-05, %v934_v20 }
 0x26b   :  { %v937_v23 = vadd.f32 1e-05, %v935_v21 }
 0x26c   :  { %1465 = vrsqrt.f32 %v936_v22 }
 0x26d   :  { %1467 = vrsqrt.f32 %v937_v23 }
 0x276   :  { %v1466_v24 = vpop.eup %1465 }
 0x277   :  { %v1468_v25 = vpop.eup %1467 }
 0x278   :  { %v942_v26 = vcombine.low %v1466_v24, %v1468_v25 }
 0x27a   :  { %v949_v27 = vrot.slane %v942_v26, %v1765_v40 }
 0x27c   :  { %v956_v29 = vrot.slane %v949_v27, %v1765_v40 }
 0x27e   :  { %v958_v30 = vmul.f32 %v956_v29, %v931_v28 }
 0x280   :  { %v964_v32 = vrot.slane %v958_v30, %v1773_v50  ;;  %v968_v33 = vrot.slane %v958_v30, %v1775_v52 }
 0x282   :  { %v971_v34 = vmul.f32 %v964_v32, %v913_v12  ;;  %v972_v35 = vmul.f32 %v968_v33, %v914_v15  ;;  %v993_v37 = vmul.f32 %v968_v33, %v897_v47  ;;  %v992_v38 = vmul.f32 %v964_v32, %v895_v44 }
 0x284   :  { %v975_v39 = vcombine.low %v971_v34, %v972_v35 }
 0x286   :  { %v982_v41 = vrot.slane %v975_v39, %v1765_v40 }
 0x288   :  { %v989_v43 = vrot.slane %v982_v41, %v1765_v40 }
 0x28a   :  { %v991_v45 = vsub.f32 %v959_v42, %v989_v43 }
 0x28c   :  { %v1002_v46 = vrot.slane %v991_v45, %v1775_v52  ;;  %v998_v48 = vrot.slane %v991_v45, %v1773_v50 }
 0x28e   :  { %v1006_v49 = vadd.f32 %v1002_v46, %v993_v37  ;;  %v1005_v53 = vadd.f32 %v998_v48, %v992_v38 }
 0x290   :  { %v1008_v54 = vmax.f32 %v1006_v49, 0.0  ;;  %v1007_v56 = vmax.f32 %v1005_v53, 0.0 }
 0x292   :  { %v1010_v47 = vpack.c.bf16 %v1008_v54, %v1008_v54  ;;  %v1009_v44 = vpack.c.bf16 %v1007_v56, %v1007_v56 }
 0x294   :  { %1178 = vmatprep.mubr.bf16.mxu1 %v1010_v47 }
 0x295   :  { %1179 = vmatmul.mubr.bf16.vlgmr.msra.gmra.mrb[4].mxu1 %v1009_v44 }
 0x368   :  { %v1311_v57 = vpop.f32.mrb[4].mxu1 }
 0x369   :  { %v1312_v59 = vpop.f32.mrb[5].mxu1 }
 0x36a   :  { %v1313_v40 = vadd.f32 %v1312_v59, %v1311_v57  ;;  %v1314_v52 = vpop.f32.mrb[6].mxu1 }
 0x36b   :  { %v1315_v60 = vpop.f32.mrb[7].mxu1 }
 0x36c   :  { %v1181_v50 = vadd.f32 %v1313_v40, %v1278_v58 }
 0x36e   :  { %1186 = vst [vmem:[#allocation11] sm:$0xff] %v1181_v50 }
 0x36f   :  { %1590 = shalt.err (!%p1587_p2)
}
 0x370   :  { %s1591_s8 = scalar_lea.hbm %s1828_s9, 128 }
 0x371   :  { %p1592_p3 = scmp.ne.s32.totalorder %s1828_s9, %s1591_s8  ;;  %p1595_p4 = scmp.lt.u32.totalorder %s1591_s8, %s1828_s9 }
 0x373   :  { %p1597_p5 = pnand %p1595_p4, %p1592_p3 }
 0x375   :  { %1600 = shalt.err (!%p1597_p5)
}
 0x376   :  { %1196 = dma.vmem_to_hbm [thread:$0]  %s1194_s12, 128, %s1828_s9, [#allocation4]  }
 0x377   :  { %1607 = dma.done.wait [#allocation4], 128  }
 0x378   :  { %1608 = vsyncadd [#allocation4], 4294967168 }
 0x379   :  { %1200 = vsyncpa [#allocation3], 1 }
 0x37a   :  { %1201 = vsyncpa [#allocation6], 1 }
 0x37b   :  { %1202 = vsyncpa [#allocation9], 1 }
 0x37c   :  { %1203 = vsyncpa [#allocation4], 1 }

</bundles_post_ra>
